<compile_context>
chip_gen: v5e
topology: v5e:2x2
jax: 0.10.0
libtpu: 0.0.40
codegen_flags: <defaults>
</compile_context>

<pallas_src>
import functools

import jax
import jax.numpy as jnp
from jax.experimental import pallas as pl
from jax.experimental.pallas import tpu as pltpu


def _round_up(x: int, m: int) -> int:
    return ((x + m - 1) // m) * m


def _tpu_vmem_capacity_bytes() -> int:
    """Best-effort per-core VMEM capacity; conservative (64 MiB) fallback."""
    try:
        info = pltpu.get_tpu_info()
        cap = getattr(info, "vmem_capacity_bytes", None)
        if cap:
            return int(cap)
    except Exception:
        pass
    try:
        kind = jax.devices()[0].device_kind.lower()
        if "v7" in kind:
            return 64 * 1024 * 1024
        if "v5" in kind or "v6" in kind:
            return 128 * 1024 * 1024
    except Exception:
        pass
    return 64 * 1024 * 1024


def _bf16_vpu_supported() -> bool:
    """bf16 VPU/EUP exist on v6e / v7x (NOT v5e)."""
    try:
        kind = jax.devices()[0].device_kind.lower()
        return ("v6" in kind) or ("v7" in kind)
    except Exception:
        return False


def _contrastive_loss_kernel(pos_ref, neg_ref, mask_ref, sum_ref, cnt_ref, *,
                             n_rows, n_cols, acc_rows, compute_dtype):
    """One (tn, ts) tile: accumulate the row-folded (acc_rows, ts) partials of
    sum(-log(sigmoid(pos-neg)) | mask) and sum(mask) straight into the
    resident output blocks (zeroed on the first seq step)."""
    i = pl.program_id(0)          # batch-tile index ("parallel")
    j = pl.program_id(1)          # seq-tile index   ("arbitrary" / reduction)

    @pl.when(j == 0)
    def _init():
        sum_ref[...] = jnp.zeros_like(sum_ref)
        cnt_ref[...] = jnp.zeros_like(cnt_ref)

    tn, ts = pos_ref.shape

    pos = pos_ref[...].astype(compute_dtype)
    neg = neg_ref[...].astype(compute_dtype)
    d = pos - neg

    # Mask streamed in its native dtype; any nonzero value counts as valid.
    m = mask_ref[...]
    valid = m if m.dtype == jnp.bool_ else (m != 0)

    # Bounds masks only when the tile does not evenly divide the array
    # (last partial block contains unspecified data).  Built from cheap
    # 1-D iotas and broadcast-ANDed (no full-tile i32 temporaries).
    if n_rows % tn:
        row_ok = (jax.lax.broadcasted_iota(jnp.int32, (tn, 1), 0)
                  < (n_rows - i * tn))
        valid = valid & row_ok
    if n_cols % ts:
        col_ok = (jax.lax.broadcasted_iota(jnp.int32, (1, ts), 1)
                  < (n_cols - j * ts))
        valid = valid & col_ok

    # Zero masked positions BEFORE the transcendentals so inf/NaN logits in
    # padded/masked slots can never poison the sum (no inf * 0 = NaN).
    d_safe = jnp.where(valid, d, 0.0)
    # -log(sigmoid(d)) = softplus(-d) = max(-d, 0) + log1p(exp(-|d|))
    relu = jnp.maximum(-d_safe, 0.0)           # compute_dtype (bf16 on v6e/v7x)
    e = jnp.exp(-jnp.abs(d_safe))              # EUP, compute_dtype
    loss = relu.astype(jnp.float32) + jnp.log1p(e.astype(jnp.float32))
    loss = jnp.where(valid, loss, 0.0)         # f32 from here on
    cnt = valid.astype(jnp.float32)

    # Fold sublane groups: (tn, ts) -> (acc_rows, ts). Pure per-vreg VALU adds
    # (the reshape only splits the leading dim, keeping the (8,128) tiling).
    if tn != acc_rows:
        loss = loss.reshape(tn // acc_rows, acc_rows, ts).sum(axis=0)
        cnt = cnt.reshape(tn // acc_rows, acc_rows, ts).sum(axis=0)

    sum_ref[...] += loss[None]
    cnt_ref[...] += cnt[None]


def sequence_recommender_contrastive_loss(positive_logits,
                                          negative_logits,
                                          mask,
                                          reduction: str = "elementwise_mean",
                                          block_n: int | None = None,
                                          block_s: int | None = None):
    """JAX/Pallas equivalent of SequenceRecommenderContrastiveLoss.forward
    (BPR instantiation).  Inputs: (N, S) logits and (N, S) mask (any dtype;
    nonzero == valid).  Returns a scalar f32 loss."""
    assert positive_logits.shape == negative_logits.shape == mask.shape
    assert positive_logits.ndim == 2
    n, s = positive_logits.shape

    # ---- generation-aware tile caps & scoped-VMEM limit ---------------------
    vmem_cap = _tpu_vmem_capacity_bytes()
    if vmem_cap >= 96 * 1024 * 1024:          # v5e / v6e (128 MiB VMEM)
        cap_n = 1024 if block_n is None else block_n
        cap_s = 2048 if block_s is None else block_s
        vmem_limit = 108 * 1024 * 1024
    else:                                     # v7x (64 MiB VMEM per TC)
        cap_n = 512 if block_n is None else block_n
        cap_s = 2048 if block_s is None else block_s
        vmem_limit = 48 * 1024 * 1024

    # Non-full-extent tiles must be multiples of (32, 128) so f32/bf16/int8/
    # bool blocks all tile cleanly.
    if n > cap_n:
        tn = max(32, (cap_n // 32) * 32)
    elif n >= 64:
        # Keep >= 2 blocks on the "parallel" batch axis so both v7x TensorCores
        # (and both sets of DMA engines) stay busy even when the batch fits
        # in one tile.  (Harmless extra ~0.35us on single-TC parts.)
        tn = _round_up(-(-n // 2), 32)
    else:
        tn = n
    ts = s if s <= cap_s else max(128, (cap_s // 128) * 128)

    grid_n = pl.cdiv(n, tn)
    grid_s = pl.cdiv(s, ts)
    acc_rows = 8 if (tn % 8 == 0) else tn     # rows of the partial accumulator

    # bf16 end-to-end compute only where the VPU/EUP support it.
    if (positive_logits.dtype == jnp.bfloat16
            and negative_logits.dtype == jnp.bfloat16
            and _bf16_vpu_supported()):
        compute_dtype = jnp.bfloat16
    else:
        compute_dtype = jnp.float32

    out_bytes = 2 * grid_n * acc_rows * ts * 4
    bytes_accessed = (positive_logits.size * positive_logits.dtype.itemsize
                      + negative_logits.size * negative_logits.dtype.itemsize
                      + mask.size * mask.dtype.itemsize
                      + out_bytes)
    cost = pl.CostEstimate(flops=8 * n * s,
                           transcendentals=2 * n * s,
                           bytes_accessed=bytes_accessed)

    kernel = functools.partial(_contrastive_loss_kernel,
                               n_rows=n, n_cols=s,
                               acc_rows=acc_rows,
                               compute_dtype=compute_dtype)

    part_sum, part_cnt = pl.pallas_call(
        kernel,
        grid=(grid_n, grid_s),
        in_specs=[
            pl.BlockSpec((tn, ts), lambda i, j: (i, j)),
            pl.BlockSpec((tn, ts), lambda i, j: (i, j)),
            pl.BlockSpec((tn, ts), lambda i, j: (i, j)),   # mask, native dtype
        ],
        out_specs=(
            pl.BlockSpec((1, acc_rows, ts), lambda i, j: (i, 0, 0)),
            pl.BlockSpec((1, acc_rows, ts), lambda i, j: (i, 0, 0)),
        ),
        out_shape=(
            jax.ShapeDtypeStruct((grid_n, acc_rows, ts), jnp.float32),
            jax.ShapeDtypeStruct((grid_n, acc_rows, ts), jnp.float32),
        ),
        compiler_params=pltpu.CompilerParams(
            dimension_semantics=("parallel", "arbitrary"),
            vmem_limit_bytes=vmem_limit,
        ),
        cost_estimate=cost,
    )(positive_logits, negative_logits, mask)

    total = jnp.sum(part_sum)
    count = jnp.sum(part_cnt)

    if reduction == "elementwise_mean":
        # Matches torch masked-mean semantics (NaN/inf if the mask is all zero).
        return total / count
    elif reduction == "sum":
        return total
    else:
        # TODO(synk): reduction='none' (per-element loss output) not wired up here.
        raise ValueError(f"unsupported reduction: {reduction}")


def _reference(pos, neg, mask, reduction="elementwise_mean"):
    keep = mask.astype(jnp.bool_)
    d = pos.astype(jnp.float32) - neg.astype(jnp.float32)
    d = jnp.where(keep, d, 0.0)
    loss = jnp.maximum(-d, 0.0) + jnp.log1p(jnp.exp(-jnp.abs(d)))
    loss = jnp.where(keep, loss, 0.0)
    total = jnp.sum(loss)
    if reduction == "elementwise_mean":
        return total / jnp.sum(keep.astype(jnp.float32))
    return total


if __name__ == "__main__":
    key = jax.random.PRNGKey(0)
    ks = jax.random.split(key, 9)

    # --- Small canonical case (single block, whole array resident) -----------
    N, S = 2, 8  # batch size, max sequence length
    pos = jax.random.normal(ks[0], (N, S), dtype=jnp.float32)
    neg = jax.random.normal(ks[1], (N, S), dtype=jnp.float32)
    msk = jax.random.bernoulli(ks[2], p=0.75, shape=(N, S))       # bool mask

    out = jax.block_until_ready(
        sequence_recommender_contrastive_loss(pos, neg, msk))
    ref = _reference(pos, neg, msk)
    assert jnp.allclose(out, ref, rtol=1e-5, atol=1e-5), (out, ref)

    # Float mask with non-{0,1} values: nonzero == valid (native streaming).
    msk_f = msk.astype(jnp.float32) * 0.5
    out_f = jax.block_until_ready(
        sequence_recommender_contrastive_loss(pos, neg, msk_f))
    ref_f = _reference(pos, neg, msk_f)
    assert jnp.allclose(out_f, ref_f, rtol=1e-5, atol=1e-5), (out_f, ref_f)

    # --- Multi-block case: grid, in-place output accumulation and both
    #     partial-edge bounds masks (non-divisible shapes). --------------------
    N2, S2 = 72, 300
    pos2 = jax.random.normal(ks[3], (N2, S2), dtype=jnp.float32)
    neg2 = jax.random.normal(ks[4], (N2, S2), dtype=jnp.float32)
    msk2 = jax.random.bernoulli(ks[5], p=0.7, shape=(N2, S2))

    out2 = jax.block_until_ready(
        sequence_recommender_contrastive_loss(pos2, neg2, msk2,
                                              block_n=32, block_s=128))
    ref2 = _reference(pos2, neg2, msk2)
    assert jnp.allclose(out2, ref2, rtol=1e-5, atol=1e-5), (out2, ref2)

    # 'sum' reduction path
    out3 = jax.block_until_ready(
        sequence_recommender_contrastive_loss(pos2, neg2, msk2, reduction="sum",
                                              block_n=32, block_s=128))
    ref3 = _reference(pos2, neg2, msk2, reduction="sum")
    assert jnp.allclose(out3, ref3, rtol=1e-5, atol=1e-5), (out3, ref3)

    # --- Default (generation-aware) tiling with the >=2-batch-tile split ------
    N3, S3 = 100, 200
    pos3 = jax.random.normal(ks[6], (N3, S3), dtype=jnp.float32)
    neg3 = jax.random.normal(ks[7], (N3, S3), dtype=jnp.float32)
    msk3 = jax.random.bernoulli(ks[8], p=0.6, shape=(N3, S3))
    out4 = jax.block_until_ready(
        sequence_recommender_contrastive_loss(pos3, neg3, msk3))
    ref4 = _reference(pos3, neg3, msk3)
    assert jnp.allclose(out4, ref4, rtol=1e-5, atol=1e-5), (out4, ref4)

    # --- bf16 logits (bf16 compute path on v6e/v7x, f32 elsewhere) ------------
    out5 = jax.block_until_ready(
        sequence_recommender_contrastive_loss(pos2.astype(jnp.bfloat16),
                                              neg2.astype(jnp.bfloat16), msk2,
                                              block_n=32, block_s=128))
    ref5 = _reference(pos2.astype(jnp.bfloat16), neg2.astype(jnp.bfloat16), msk2)
    assert jnp.allclose(out5, ref5, rtol=3e-2, atol=3e-2), (out5, ref5)

    print("KERNEL_OK")
</pallas_src>

<mosaic_0001>
module attributes {stable_mosaic.version = 11 : i64} {
  func.func @_contrastive_loss_kernel(%arg0: i32, %arg1: i32, %arg2: memref<2x8xf32, #tpu.memory_space<vmem>>, %arg3: memref<2x8xf32, #tpu.memory_space<vmem>>, %arg4: memref<2x8xi32, #tpu.memory_space<vmem>>, %arg5: memref<1x2x8xf32, #tpu.memory_space<vmem>>, %arg6: memref<1x2x8xf32, #tpu.memory_space<vmem>>) attributes {dimension_semantics = [#tpu.dimension_semantics<parallel>, #tpu.dimension_semantics<arbitrary>], iteration_bounds = array<i64: 1, 1>, scalar_prefetch = 0 : i64, scratch_operands = 0 : i64, tpu.core_type = #tpu.core_type<tc>, window_params = [{transform_indices = @transform_0, window_bounds = array<i64: 2, 8>}, {transform_indices = @transform_1, window_bounds = array<i64: 2, 8>}, {transform_indices = @transform_2, window_bounds = array<i64: 2, 8>}, {transform_indices = @transform_3, window_bounds = array<i64: 1, 2, 8>}, {transform_indices = @transform_4, window_bounds = array<i64: 1, 2, 8>}]} {
    %c0_i32 = arith.constant 0 : i32
    %0 = arith.cmpi eq, %arg1, %c0_i32 : i32
    %1 = arith.extui %0 : i1 to i32
    %c0_i32_0 = arith.constant 0 : i32
    %2 = arith.cmpi ne, %1, %c0_i32_0 : i32
    scf.if %2 {
      %cst_23 = arith.constant 0.000000e+00 : f32
      %32 = vector.broadcast %cst_23 : f32 to vector<1x2x8xf32>
      %c0_24 = arith.constant 0 : index
      %c0_25 = arith.constant 0 : index
      %c0_26 = arith.constant 0 : index
      %33 = vector.load %arg5[%c0_24, %c0_25, %c0_26] : memref<1x2x8xf32, #tpu.memory_space<vmem>>, vector<1x2x8xf32>
      tpu.vector_store %arg5[%c0_24, %c0_25, %c0_26], %32 {strides = array<i32>} : memref<1x2x8xf32, #tpu.memory_space<vmem>>, vector<1x2x8xf32>,
      %cst_27 = arith.constant 0.000000e+00 : f32
      %34 = vector.broadcast %cst_27 : f32 to vector<1x2x8xf32>
      %c0_28 = arith.constant 0 : index
      %c0_29 = arith.constant 0 : index
      %c0_30 = arith.constant 0 : index
      %35 = vector.load %arg6[%c0_28, %c0_29, %c0_30] : memref<1x2x8xf32, #tpu.memory_space<vmem>>, vector<1x2x8xf32>
      tpu.vector_store %arg6[%c0_28, %c0_29, %c0_30], %34 {strides = array<i32>} : memref<1x2x8xf32, #tpu.memory_space<vmem>>, vector<1x2x8xf32>,
    } else {
    }
    %c0 = arith.constant 0 : index
    %c0_1 = arith.constant 0 : index
    %3 = vector.load %arg2[%c0, %c0_1] : memref<2x8xf32, #tpu.memory_space<vmem>>, vector<2x8xf32>
    %c0_2 = arith.constant 0 : index
    %c0_3 = arith.constant 0 : index
    %4 = vector.load %arg3[%c0_2, %c0_3] : memref<2x8xf32, #tpu.memory_space<vmem>>, vector<2x8xf32>
    %5 = arith.subf %3, %4 : vector<2x8xf32>
    %c0_4 = arith.constant 0 : index
    %c0_5 = arith.constant 0 : index
    %6 = vector.load %arg4[%c0_4, %c0_5] : memref<2x8xi32, #tpu.memory_space<vmem>>, vector<2x8xi32>
    %cst = arith.constant dense<0> : vector<2x8xi32>
    %7 = arith.cmpi ne, %6, %cst : vector<2x8xi32>
    %cst_6 = arith.constant 0.000000e+00 : f32
    %8 = vector.broadcast %cst_6 : f32 to vector<2x8xf32>
    %9 = arith.select %7, %5, %8 : vector<2x8xi1>, vector<2x8xf32>
    %cst_7 = arith.constant 0.000000e+00 : f32
    %10 = vector.broadcast %cst_7 : f32 to vector<2x8xf32>
    %11 = arith.subf %10, %9 : vector<2x8xf32>
    %cst_8 = arith.constant 0.000000e+00 : f32
    %12 = vector.broadcast %cst_8 : f32 to vector<2x8xf32>
    %13 = arith.maximumf %11, %12 : vector<2x8xf32>
    %14 = math.absf %9 : vector<2x8xf32>
    %cst_9 = arith.constant 0.000000e+00 : f32
    %15 = vector.broadcast %cst_9 : f32 to vector<2x8xf32>
    %16 = arith.subf %15, %14 : vector<2x8xf32>
    %17 = math.exp %16 : vector<2x8xf32>
    %18 = math.log1p %17 : vector<2x8xf32>
    %19 = arith.addf %13, %18 : vector<2x8xf32>
    %cst_10 = arith.constant 0.000000e+00 : f32
    %20 = vector.broadcast %cst_10 : f32 to vector<2x8xf32>
    %21 = arith.select %7, %19, %20 : vector<2x8xi1>, vector<2x8xf32>
    %22 = arith.extui %7 : vector<2x8xi1> to vector<2x8xi32>
    %23 = arith.sitofp %22 : vector<2x8xi32> to vector<2x8xf32>
    %c0_11 = arith.constant 0 : index
    %c0_12 = arith.constant 0 : index
    %c0_13 = arith.constant 0 : index
    %24 = vector.load %arg5[%c0_11, %c0_12, %c0_13] : memref<1x2x8xf32, #tpu.memory_space<vmem>>, vector<1x2x8xf32>
    %25 = vector.shape_cast %21 : vector<2x8xf32> to vector<1x2x8xf32>
    %26 = arith.addf %24, %25 : vector<1x2x8xf32>
    %c0_14 = arith.constant 0 : index
    %c0_15 = arith.constant 0 : index
    %c0_16 = arith.constant 0 : index
    %27 = vector.load %arg5[%c0_14, %c0_15, %c0_16] : memref<1x2x8xf32, #tpu.memory_space<vmem>>, vector<1x2x8xf32>
    tpu.vector_store %arg5[%c0_14, %c0_15, %c0_16], %26 {strides = array<i32>} : memref<1x2x8xf32, #tpu.memory_space<vmem>>, vector<1x2x8xf32>,
    %c0_17 = arith.constant 0 : index
    %c0_18 = arith.constant 0 : index
    %c0_19 = arith.constant 0 : index
    %28 = vector.load %arg6[%c0_17, %c0_18, %c0_19] : memref<1x2x8xf32, #tpu.memory_space<vmem>>, vector<1x2x8xf32>
    %29 = vector.shape_cast %23 : vector<2x8xf32> to vector<1x2x8xf32>
    %30 = arith.addf %28, %29 : vector<1x2x8xf32>
    %c0_20 = arith.constant 0 : index
    %c0_21 = arith.constant 0 : index
    %c0_22 = arith.constant 0 : index
    %31 = vector.load %arg6[%c0_20, %c0_21, %c0_22] : memref<1x2x8xf32, #tpu.memory_space<vmem>>, vector<1x2x8xf32>
    tpu.vector_store %arg6[%c0_20, %c0_21, %c0_22], %30 {strides = array<i32>} : memref<1x2x8xf32, #tpu.memory_space<vmem>>, vector<1x2x8xf32>,
    return
  }
  func.func @transform_0(%arg0: i32, %arg1: i32) -> (i32, i32) {
    %c0_i32 = arith.constant 0 : i32
    return %arg0, %arg1 : i32, i32
  }
  func.func @transform_1(%arg0: i32, %arg1: i32) -> (i32, i32) {
    %c0_i32 = arith.constant 0 : i32
    return %arg0, %arg1 : i32, i32
  }
  func.func @transform_2(%arg0: i32, %arg1: i32) -> (i32, i32) {
    %c0_i32 = arith.constant 0 : i32
    return %arg0, %arg1 : i32, i32
  }
  func.func @transform_3(%arg0: i32, %arg1: i32) -> (i32, i32, i32) {
    %c0_i32 = arith.constant 0 : i32
    %c0_i32_0 = arith.constant 0 : i32
    %c0_i32_1 = arith.constant 0 : i32
    return %arg0, %c0_i32, %c0_i32_0 : i32, i32, i32
  }
  func.func @transform_4(%arg0: i32, %arg1: i32) -> (i32, i32, i32) {
    %c0_i32 = arith.constant 0 : i32
    %c0_i32_0 = arith.constant 0 : i32
    %c0_i32_1 = arith.constant 0 : i32
    return %arg0, %c0_i32, %c0_i32_0 : i32, i32, i32
  }
}

</mosaic_0001>

<bundles_post_ra>
// kernel: tpu_custom_call.1
= control target key start
LH: loop header
LB: loop body
LE: loop exit
PB: predicated region body
PF: predicated region fallthrough
CT: control target
= control target key end

     0   :  { %10 = vsyncpa [#allocation3], 0  ;;  %s242_s0 = inlined_call_operand.vmem [shape: f32[2,8], index: 0, kind: input, shape index: {}]   ;;  %s243_s1 = inlined_call_operand.hbm [shape: f32[2,8], index: 1, kind: input, shape index: {}]   ;;  %s244_s2 = inlined_call_operand.vmem [shape: s32[2,8], index: 2, kind: input, shape index: {}]   ;;  %s245_s3 = inlined_call_operand.hbm [shape: f32[1,2,8], index: 3, kind: output, shape index: {0}]   ;;  %s246_s4 = inlined_call_operand.hbm [shape: f32[1,2,8], index: 4, kind: output, shape index: {1}]  }
   0x1   :  { %11 = vsyncpa [#allocation4], 0 }
   0x2   :  { %12 = vsyncpa [#allocation7], 0  ;;  %s20_s17 = sshll.u32 %s243_s1, 4  ;;  %s191_s18 = smov [#allocation2]   ;;  %s21_s17 = int_to_ptr.hbm [resolvable:$true] %s20_s17 }
   0x3   :  { %s22_s19 = sshll.u32 %s191_s18, 4  ;;  %s23_s19 = int_to_ptr.vmem [resolvable:$true] %s22_s19 }
   0x4   :  { %25 = dma.hbm_to_vmem [thread:$0]  %s21_s17, 32, %s23_s19, [#allocation3]  }
   0x5   :  { %185 = dma.done.wait [#allocation3], 32  }
   0x6   :  { %186 = vsyncadd [#allocation3], 4294967264  ;;  %vm36_vm0 = vcmask 58368   ;;  %v192_v0 = vmov 0.0   ;;  %s193_s20 = smov [#allocation6]   ;;  %s89_s24 = sshll.u32 %s246_s4, 4  ;;  %s90_s24 = int_to_ptr.hbm [resolvable:$true] %s89_s24 }
   0x7   :  { %37 = vst.msk [vmem:[#allocation5] sm:$0x3] %vm36_vm0, %v192_v0  ;;  %s87_s21 = sshll.u32 %s193_s20, 4  ;;  %v39_v1 = vld [vmem:[%s242_s0] sm:$0x3]  ;;  %s194_s0 = smov [#allocation5]   ;;  %s88_s21 = int_to_ptr.vmem [resolvable:$true] %s87_s21 }
   0x8   :  { %38 = vst.msk [vmem:[#allocation6] sm:$0x3] %vm36_vm0, %v192_v0  ;;  %v40_v2 = vld [vmem:[#allocation2] sm:$0x3]  ;;  %s78_s29 = sshll.u32 %s245_s3, 4  ;;  %s79_s29 = int_to_ptr.hbm [resolvable:$true] %s78_s29 }
   0x9   :  { %v42_v3 = vld [vmem:[%s244_s2] sm:$0x3]  ;;  %v41_v4 = vsub.f32 %v39_v1, %v40_v2  ;;  %s76_s2 = sshll.u32 %s194_s0, 4  ;;  %s77_s2 = int_to_ptr.vmem [resolvable:$true] %s76_s2 }
   0xa   :  { %vm43_vm1 = vcmp.ne.s32.totalorder %v42_v3, 0 }
   0xb   :  { %v104_v5 = vsel %vm43_vm1, 1.0, %v192_v0  ;;  %v44_v7 = vsel %vm43_vm1, %v41_v4, 0.0 }
   0xc   :  { %v47_v9 = vand.u32 2147483647, %v44_v7  ;;  %v45_v16 = vsub.f32 0.0, %v44_v7 }
   0xe   :  { %v48_v10 = vsub.f32 0.0, %v47_v9  ;;  %v46_v20 = vmax.f32 %v45_v16, 0.0  ;;  %v64_v24 = vld [vmem:[#allocation5] sm:$0x3] }
   0xf   :  { %v68_v6 = vld [vmem:[#allocation6] sm:$0x3] }
  0x10   :  { %v69_v8 = vadd.f32 %v104_v5, %v68_v6  ;;  %v49_v11 = vmul.f32 1.442695, %v48_v10 }
  0x12   :  { %70 = vst.msk [vmem:[#allocation6] sm:$0x3] %vm36_vm0, %v69_v8  ;;  %109 = vpow2.f32 %v49_v11 }
  0x13   :  { %92 = dma.vmem_to_hbm [thread:$0]  %s88_s21, 32, %s90_s24, [#allocation7]  }
  0x18   :  { %v110_v12 = vpop.eup %109 }
  0x19   :  { %v51_v13 = vadd.f32 1.0, %v110_v12  ;;  %v54_v14 = vmul.f32 -0.5, %v110_v12  ;;  %v57_v17 = vand.u32 2147483647, %v110_v12 }
  0x1b   :  { %111 = vlog2.f32 %v51_v13  ;;  %v55_v15 = vadd.f32 1.0, %v54_v14  ;;  %vm58_vm2 = vcmp.lt.f32.partialorder %v57_v17, 0.0004427343 }
  0x1d   :  { %v56_v18 = vmul.f32 %v110_v12, %v55_v15 }
  0x21   :  { %v112_v19 = vpop.eup %111 }
  0x22   :  { %v53_v21 = vmul.f32 0.6931472, %v112_v19 }
  0x24   :  { %v59_v22 = vsel %vm58_vm2, %v56_v18, %v53_v21 }
  0x25   :  { %v60_v23 = vadd.f32 %v59_v22, %v46_v20 }
  0x27   :  { %v61_v25 = vsel %vm43_vm1, %v60_v23, 0.0 }
  0x28   :  { %v65_v26 = vadd.f32 %v64_v24, %v61_v25 }
  0x2a   :  { %67 = vst.msk [vmem:[#allocation5] sm:$0x3] %vm36_vm0, %v65_v26 }
  0x2b   :  { %81 = dma.vmem_to_hbm [thread:$0]  %s77_s2, 32, %s79_s29, [#allocation4]  }
  0x2c   :  { %187 = dma.done.wait [#allocation4], 32  }
  0x2d   :  { %188 = vsyncadd [#allocation4], 4294967264 }
  0x2e   :  { %189 = dma.done.wait [#allocation7], 32  }
  0x2f   :  { %190 = vsyncadd [#allocation7], 4294967264 }
  0x30   :  { %101 = vsyncpa [#allocation3], 1 }
  0x31   :  { %102 = vsyncpa [#allocation4], 1 }
  0x32   :  { %103 = vsyncpa [#allocation7], 1 }

</bundles_post_ra>
